<compile_context>
chip_gen: v6e
topology: v6e:2x2x1
jax: 0.10.0
libtpu: 0.0.40
codegen_flags: <defaults>
</compile_context>

<pallas_src>
import jax
import jax.numpy as jnp
from jax.experimental import pallas as pl
from jax.experimental.pallas import tpu as pltpu


def _round_up(x: int, m: int) -> int:
    return ((x + m - 1) // m) * m


def _cdiv(a: int, b: int) -> int:
    return (a + b - 1) // b


def _vmem_cap_bytes() -> int:
    """Per-generation VMEM budget: physical capacity minus headroom."""
    try:
        cap = int(pltpu.get_tpu_info().vmem_capacity_bytes)
    except Exception:
        cap = 64 << 20  # conservative fallback (v7x per-TC physical VMEM)
    # ~48 MiB on v7x (64 MiB physical), ~104 MiB on v5e/v6e (128 MiB physical).
    return max(cap - (24 << 20), (cap * 3) // 4)


def _choose_tk(k_pad, h_pad, g_pad, tb, act_size, p_size, cap):
    """Largest 128-multiple divisor of k_pad whose streamed footprint fits."""
    fixed = (h_pad * g_pad * p_size + (h_pad + g_pad) * 4   # W2 + biases
             + tb * h_pad * 4                                # f32 accumulator
             + 2 * tb * g_pad * 4)                           # out tile (x2)
    n = k_pad // 128
    tk = 128
    for d in sorted((d for d in range(1, n + 1) if n % d == 0), reverse=True):
        cand = d * 128
        need = fixed + 2 * tb * cand * act_size + 2 * cand * h_pad * p_size
        if need <= cap:
            tk = cand
            break
    return tk


# --------------------------------------------------------------------------
# Kernels
# --------------------------------------------------------------------------
def _policy_head_kernel(x_ref, w1_ref, b1_ref, w2_ref, b2_ref, o_ref):
    """Resident-weights path: one batch tile per grid step.

    x:  (TB, K_pad)    bf16
    w1: (K_pad, H_pad) bf16  (VMEM-resident, single-buffered)
    b1: (1, H_pad)     f32
    w2: (H_pad, G_pad) bf16  (VMEM-resident, single-buffered)
    b2: (1, G_pad)     f32
    o:  (TB, G_pad)    f32
    """
    h = jnp.dot(x_ref[...], w1_ref[...],
                preferred_element_type=jnp.float32) + b1_ref[...]
    h = jnp.maximum(h, 0.0)                       # relu (f32 epilogue, v5e-safe)
    logits = jnp.dot(h.astype(w2_ref.dtype), w2_ref[...],
                     preferred_element_type=jnp.float32) + b2_ref[...]
    o_ref[...] = logits                           # full-lane unmasked store


def _policy_head_kstream_kernel(x_ref, w1_ref, b1_ref, w2_ref, b2_ref, o_ref,
                                acc_ref):
    """K-streaming path: W1 streamed in (tk, H_pad) tiles, f32 accumulator."""
    k = pl.program_id(1)

    @pl.when(k == 0)
    def _():
        acc_ref[...] = jnp.zeros_like(acc_ref)

    acc_ref[...] += jnp.dot(x_ref[...], w1_ref[...],
                            preferred_element_type=jnp.float32)

    @pl.when(k == pl.num_programs(1) - 1)
    def _():
        h = jnp.maximum(acc_ref[...] + b1_ref[...], 0.0)
        logits = jnp.dot(h.astype(w2_ref.dtype), w2_ref[...],
                         preferred_element_type=jnp.float32) + b2_ref[...]
        o_ref[...] = logits


# --------------------------------------------------------------------------
# Host-side wrappers
# --------------------------------------------------------------------------
def prepare_policy_head_params(w1, b1, w2, b2, *, param_dtype=jnp.bfloat16):
    """One-time pad/cast of head parameters (hoisted out of the forward pass).

    Weights are stored (in, out) so the kernel computes x @ W + b. Feature dims
    are zero-padded to multiples of 128 (lane-dense); padding is exact for this
    head: padded hidden columns are relu(0+0)=0 and meet zero rows of W2.
    """
    lm_size, hidden = w1.shape
    n_goals = w2.shape[1]
    k_pad = _round_up(lm_size, 128)
    h_pad = _round_up(hidden, 128)
    g_pad = _round_up(n_goals, 128)
    w1p = jnp.pad(w1.astype(param_dtype),
                  ((0, k_pad - lm_size), (0, h_pad - hidden)))
    b1p = jnp.pad(b1.reshape(1, -1).astype(jnp.float32),
                  ((0, 0), (0, h_pad - hidden)))
    w2p = jnp.pad(w2.astype(param_dtype),
                  ((0, h_pad - hidden), (0, g_pad - n_goals)))
    b2p = jnp.pad(b2.reshape(1, -1).astype(jnp.float32),
                  ((0, 0), (0, g_pad - n_goals)))
    dims = dict(lm_size=lm_size, hidden=hidden, n_goals=n_goals,
                k_pad=k_pad, h_pad=h_pad, g_pad=g_pad)
    return (w1p, b1p, w2p, b2p), dims


def policy_head(cls_token, padded_params, dims, *, block_b: int = 512,
                force_stream_k: bool = False, stream_tk=None):
    """Fused proj -> relu -> out head on pre-padded bf16 parameters.

    cls_token: (B, lm_size) activations. Returns (B, n_goals) f32 logits.
    """
    w1p, b1p, w2p, b2p = padded_params
    lm_size, n_goals = dims["lm_size"], dims["n_goals"]
    k_pad, h_pad, g_pad = dims["k_pad"], dims["h_pad"], dims["g_pad"]

    B = cls_token.shape[0]
    assert cls_token.shape[1] == lm_size

    act_dtype = w1p.dtype                       # bf16 into the MXU
    act_size = jnp.dtype(act_dtype).itemsize
    p_size = jnp.dtype(w1p.dtype).itemsize

    # ---- batch tiling ------------------------------------------------------
    b_pad8 = _round_up(B, 8)
    if B >= 16:
        # >= 2 grid steps so the "parallel" batch axis can shard across v7x's
        # two TensorCores (no effect on single-TC v5e/v6e).
        tb = min(block_b, _round_up(_cdiv(b_pad8, 2), 8))
    else:
        tb = min(block_b, b_pad8)
    b_pad = _round_up(B, tb)
    grid_b = b_pad // tb

    # bf16 activations: half the HBM->VMEM DMA + half the x-tile VMEM.
    x = jnp.pad(cls_token.astype(act_dtype),
                ((0, b_pad - B), (0, k_pad - lm_size)))

    # ---- VMEM budget & strategy selection -----------------------------------
    vmem_cap = _vmem_cap_bytes()
    small_params = h_pad * g_pad * p_size + (h_pad + g_pad) * 4  # W2 + biases
    w1_bytes = k_pad * h_pad * p_size
    est_resident = (2 * tb * k_pad * act_size        # double-buffered x tile
                    + 2 * tb * g_pad * 4             # double-buffered out tile
                    + w1_bytes + small_params        # single-buffered params
                    + tb * h_pad * 4)                # in-flight f32 hidden tile
    stream_k = force_stream_k or est_resident > vmem_cap

    flops = 2 * b_pad * (k_pad * h_pad + h_pad * g_pad)
    bytes_accessed = (b_pad * k_pad * act_size + w1_bytes + small_params
                      + b_pad * g_pad * 4)
    cost = pl.CostEstimate(flops=flops, transcendentals=0,
                           bytes_accessed=bytes_accessed)

    if not stream_k:
        vmem_limit = int(min(vmem_cap, max(32 << 20, (est_resident * 5) // 4)))
        out = pl.pallas_call(
            _policy_head_kernel,
            out_shape=jax.ShapeDtypeStruct((b_pad, g_pad), jnp.float32),
            grid=(grid_b,),
            in_specs=[
                pl.BlockSpec((tb, k_pad), lambda i: (i, 0)),       # activations
                pl.BlockSpec((k_pad, h_pad), lambda i: (0, 0),     # W1 resident
                             pipeline_mode=pl.Buffered(1)),
                pl.BlockSpec((1, h_pad), lambda i: (0, 0),         # b1
                             pipeline_mode=pl.Buffered(1)),
                pl.BlockSpec((h_pad, g_pad), lambda i: (0, 0),     # W2 resident
                             pipeline_mode=pl.Buffered(1)),
                pl.BlockSpec((1, g_pad), lambda i: (0, 0),         # b2
                             pipeline_mode=pl.Buffered(1)),
            ],
            out_specs=pl.BlockSpec((tb, g_pad), lambda i: (i, 0)),
            compiler_params=pltpu.CompilerParams(
                dimension_semantics=("parallel",),
                vmem_limit_bytes=vmem_limit,
            ),
            cost_estimate=cost,
        )(x, w1p, b1p, w2p, b2p)
    else:
        # K-streaming fallback: W1 does not comfortably fit VMEM-resident.
        if stream_tk is not None:
            tk = stream_tk
        else:
            tk = _choose_tk(k_pad, h_pad, g_pad, tb, act_size, p_size, vmem_cap)
        assert tk % 128 == 0 and k_pad % tk == 0, (tk, k_pad)
        grid_k = k_pad // tk
        est_stream = (2 * tb * tk * act_size + 2 * tk * h_pad * p_size
                      + small_params + tb * h_pad * 4 + 2 * tb * g_pad * 4)
        if est_stream > vmem_cap:
            raise ValueError(
                "policy_head does not fit VMEM even when streaming W1: need "
                f"~{est_stream >> 20} MiB, cap {vmem_cap >> 20} MiB; "
                "reduce block_b or hidden_size.")
        vmem_limit = int(min(vmem_cap, max(32 << 20, (est_stream * 5) // 4)))
        out = pl.pallas_call(
            _policy_head_kstream_kernel,
            out_shape=jax.ShapeDtypeStruct((b_pad, g_pad), jnp.float32),
            grid=(grid_b, grid_k),
            in_specs=[
                pl.BlockSpec((tb, tk), lambda i, k: (i, k)),       # activations
                pl.BlockSpec((tk, h_pad), lambda i, k: (k, 0)),    # W1 streamed
                pl.BlockSpec((1, h_pad), lambda i, k: (0, 0),      # b1
                             pipeline_mode=pl.Buffered(1)),
                pl.BlockSpec((h_pad, g_pad), lambda i, k: (0, 0),  # W2 resident
                             pipeline_mode=pl.Buffered(1)),
                pl.BlockSpec((1, g_pad), lambda i, k: (0, 0),      # b2
                             pipeline_mode=pl.Buffered(1)),
            ],
            out_specs=pl.BlockSpec((tb, g_pad), lambda i, k: (i, 0)),
            scratch_shapes=[pltpu.VMEM((tb, h_pad), jnp.float32)],
            compiler_params=pltpu.CompilerParams(
                dimension_semantics=("parallel", "arbitrary"),
                vmem_limit_bytes=vmem_limit,
            ),
            cost_estimate=cost,
        )(x, w1p, b1p, w2p, b2p)

    return out[:B, :n_goals]


def policy_model_forward(plm_output, padded_params, dims, **head_kwargs):
    """Mirror of PolicyModel.forward given the (synthetic) plm output."""
    # TODO(synk): the pretrained LM itself is not translated; CLS slice is
    # plain-JAX glue (fused by XLA into the kernel's input copy under jit).
    cls_token = plm_output[:, 0, :]
    return policy_head(cls_token, padded_params, dims, **head_kwargs)


def _reference(plm_output, w1, b1, w2, b2):
    """Plain-JAX reference mirroring the kernel's bf16-in / f32-acc policy."""
    cdt = jnp.bfloat16
    cls = plm_output[:, 0, :]
    h = jnp.maximum(
        jnp.dot(cls.astype(cdt), w1.astype(cdt),
                preferred_element_type=jnp.float32) + b1[None, :], 0.0)
    return jnp.dot(h.astype(cdt), w2.astype(cdt),
                   preferred_element_type=jnp.float32) + b2[None, :]


if __name__ == "__main__":
    # ---- small, deterministic setup consistent with the module ----
    B, S = 2, 8
    lm_size, hidden_size, n_goals = 32, 32, 8

    key = jax.random.PRNGKey(0)
    (k_plm, k_w1, k_b1, k_w2, k_b2,
     k_plm2, k_w12, k_b12, k_w22, k_b22) = jax.random.split(key, 10)

    # Synthetic plm(**inputs)[0] output: (B, S, lm_size)
    plm_output = jax.random.normal(k_plm, (B, S, lm_size), dtype=jnp.float32)

    # PyTorch-Linear-style uniform init, weights stored (in, out).
    bound1 = 1.0 / (lm_size ** 0.5)
    w1 = jax.random.uniform(k_w1, (lm_size, hidden_size), jnp.float32, -bound1, bound1)
    b1 = jax.random.uniform(k_b1, (hidden_size,), jnp.float32, -bound1, bound1)
    bound2 = 1.0 / (hidden_size ** 0.5)
    w2 = jax.random.uniform(k_w2, (hidden_size, n_goals), jnp.float32, -bound2, bound2)
    b2 = jax.random.uniform(k_b2, (n_goals,), jnp.float32, -bound2, bound2)

    # One-time parameter prep (pad + bf16 cast hoisted out of the forward).
    params, dims = prepare_policy_head_params(w1, b1, w2, b2)

    forward = jax.jit(lambda po, pr: policy_model_forward(po, pr, dims))
    logits = forward(plm_output, params)
    jax.block_until_ready(logits)

    ref = _reference(plm_output, w1, b1, w2, b2)
    assert logits.shape == (B, n_goals), logits.shape
    assert jnp.allclose(logits, ref, atol=2e-3, rtol=2e-3), "mismatch (resident path)"

    # ---- also exercise the K-streaming fallback path at small shapes ----
    B2, lm2, hid2, g2 = 32, 256, 64, 8
    plm_output2 = jax.random.normal(k_plm2, (B2, S, lm2), dtype=jnp.float32)
    bnd1 = 1.0 / (lm2 ** 0.5)
    w12 = jax.random.uniform(k_w12, (lm2, hid2), jnp.float32, -bnd1, bnd1)
    b12 = jax.random.uniform(k_b12, (hid2,), jnp.float32, -bnd1, bnd1)
    bnd2 = 1.0 / (hid2 ** 0.5)
    w22 = jax.random.uniform(k_w22, (hid2, g2), jnp.float32, -bnd2, bnd2)
    b22 = jax.random.uniform(k_b22, (g2,), jnp.float32, -bnd2, bnd2)

    params2, dims2 = prepare_policy_head_params(w12, b12, w22, b22)
    forward2 = jax.jit(lambda po, pr: policy_model_forward(
        po, pr, dims2, force_stream_k=True, stream_tk=128))
    logits2 = forward2(plm_output2, params2)
    jax.block_until_ready(logits2)

    ref2 = _reference(plm_output2, w12, b12, w22, b22)
    assert logits2.shape == (B2, g2), logits2.shape
    assert jnp.allclose(logits2, ref2, atol=2e-3, rtol=2e-3), "mismatch (stream-K path)"

    print("KERNEL_OK")
</pallas_src>

<mosaic_0001>
module attributes {stable_mosaic.version = 11 : i64} {
  func.func @_policy_head_kernel(%arg0: i32, %arg1: memref<8x128xbf16, #tpu.memory_space<vmem>>, %arg2: memref<128x128xbf16, #tpu.memory_space<vmem>>, %arg3: memref<1x128xf32, #tpu.memory_space<vmem>>, %arg4: memref<128x128xbf16, #tpu.memory_space<vmem>>, %arg5: memref<1x128xf32, #tpu.memory_space<vmem>>, %arg6: memref<8x128xf32, #tpu.memory_space<vmem>>) attributes {dimension_semantics = [#tpu.dimension_semantics<parallel>], iteration_bounds = array<i64: 1>, scalar_prefetch = 0 : i64, scratch_operands = 0 : i64, tpu.core_type = #tpu.core_type<tc>, window_params = [{transform_indices = @transform_0, window_bounds = array<i64: 8, 128>}, {pipeline_mode = #tpu.pipeline_mode<synchronous>, transform_indices = @transform_1, window_bounds = array<i64: 128, 128>}, {pipeline_mode = #tpu.pipeline_mode<synchronous>, transform_indices = @transform_2, window_bounds = array<i64: 1, 128>}, {pipeline_mode = #tpu.pipeline_mode<synchronous>, transform_indices = @transform_3, window_bounds = array<i64: 128, 128>}, {pipeline_mode = #tpu.pipeline_mode<synchronous>, transform_indices = @transform_4, window_bounds = array<i64: 1, 128>}, {transform_indices = @transform_5, window_bounds = array<i64: 8, 128>}]} {
    %c0 = arith.constant 0 : index
    %c0_0 = arith.constant 0 : index
    %0 = vector.load %arg1[%c0, %c0_0] : memref<8x128xbf16, #tpu.memory_space<vmem>>, vector<8x128xbf16>
    %c0_1 = arith.constant 0 : index
    %c0_2 = arith.constant 0 : index
    %1 = vector.load %arg2[%c0_1, %c0_2] : memref<128x128xbf16, #tpu.memory_space<vmem>>, vector<128x128xbf16>
    %cst = arith.constant dense<0.000000e+00> : vector<8x128xf32>
    %2 = tpu.matmul %0, %1, %cst {dimension_numbers = #tpu.dot_dimension_numbers<[1], [0], [0], [1], [0, 0, 1, 1], [], []>} : vector<8x128xbf16>, vector<128x128xbf16>, vector<8x128xf32> -> vector<8x128xf32>
    %c0_3 = arith.constant 0 : index
    %c0_4 = arith.constant 0 : index
    %3 = vector.load %arg3[%c0_3, %c0_4] : memref<1x128xf32, #tpu.memory_space<vmem>>, vector<1x128xf32>
    %4 = vector.broadcast %3 : vector<1x128xf32> to vector<8x128xf32>
    %5 = arith.addf %2, %4 : vector<8x128xf32>
    %cst_5 = arith.constant 0.000000e+00 : f32
    %6 = vector.broadcast %cst_5 : f32 to vector<8x128xf32>
    %7 = arith.maximumf %5, %6 : vector<8x128xf32>
    %8 = arith.truncf %7 : vector<8x128xf32> to vector<8x128xbf16>
    %c0_6 = arith.constant 0 : index
    %c0_7 = arith.constant 0 : index
    %9 = vector.load %arg4[%c0_6, %c0_7] : memref<128x128xbf16, #tpu.memory_space<vmem>>, vector<128x128xbf16>
    %cst_8 = arith.constant dense<0.000000e+00> : vector<8x128xf32>
    %10 = tpu.matmul %8, %9, %cst_8 {dimension_numbers = #tpu.dot_dimension_numbers<[1], [0], [0], [1], [0, 0, 1, 1], [], []>} : vector<8x128xbf16>, vector<128x128xbf16>, vector<8x128xf32> -> vector<8x128xf32>
    %c0_9 = arith.constant 0 : index
    %c0_10 = arith.constant 0 : index
    %11 = vector.load %arg5[%c0_9, %c0_10] : memref<1x128xf32, #tpu.memory_space<vmem>>, vector<1x128xf32>
    %12 = vector.broadcast %11 : vector<1x128xf32> to vector<8x128xf32>
    %13 = arith.addf %10, %12 : vector<8x128xf32>
    %c0_11 = arith.constant 0 : index
    %c0_12 = arith.constant 0 : index
    %14 = vector.load %arg6[%c0_11, %c0_12] : memref<8x128xf32, #tpu.memory_space<vmem>>, vector<8x128xf32>
    tpu.vector_store %arg6[%c0_11, %c0_12], %13 {strides = array<i32>} : memref<8x128xf32, #tpu.memory_space<vmem>>, vector<8x128xf32>,
    return
  }
  func.func @transform_0(%arg0: i32) -> (i32, i32) {
    %c0_i32 = arith.constant 0 : i32
    %c0_i32_0 = arith.constant 0 : i32
    return %arg0, %c0_i32 : i32, i32
  }
  func.func @transform_1(%arg0: i32) -> (i32, i32) {
    %c0_i32 = arith.constant 0 : i32
    %c0_i32_0 = arith.constant 0 : i32
    %c0_i32_1 = arith.constant 0 : i32
    return %c0_i32, %c0_i32_0 : i32, i32
  }
  func.func @transform_2(%arg0: i32) -> (i32, i32) {
    %c0_i32 = arith.constant 0 : i32
    %c0_i32_0 = arith.constant 0 : i32
    %c0_i32_1 = arith.constant 0 : i32
    return %c0_i32, %c0_i32_0 : i32, i32
  }
  func.func @transform_3(%arg0: i32) -> (i32, i32) {
    %c0_i32 = arith.constant 0 : i32
    %c0_i32_0 = arith.constant 0 : i32
    %c0_i32_1 = arith.constant 0 : i32
    return %c0_i32, %c0_i32_0 : i32, i32
  }
  func.func @transform_4(%arg0: i32) -> (i32, i32) {
    %c0_i32 = arith.constant 0 : i32
    %c0_i32_0 = arith.constant 0 : i32
    %c0_i32_1 = arith.constant 0 : i32
    return %c0_i32, %c0_i32_0 : i32, i32
  }
  func.func @transform_5(%arg0: i32) -> (i32, i32) {
    %c0_i32 = arith.constant 0 : i32
    %c0_i32_0 = arith.constant 0 : i32
    return %arg0, %c0_i32 : i32, i32
  }
}

</mosaic_0001>

<bundles_post_ra>
// kernel: _lambda_.1
= control target key start
LH: loop header
LB: loop body
LE: loop exit
PB: predicated region body
PF: predicated region fallthrough
CT: control target
= control target key end

     0   :  { %10 = vsyncpa [#allocation3], 0  ;;  %s477_s0 = inlined_call_operand.vmem [shape: bf16[8,128], index: 0, kind: input, shape index: {}]   ;;  %s478_s1 = inlined_call_operand.hbm [shape: bf16[128,128], index: 1, kind: input, shape index: {}]   ;;  %s479_s2 = inlined_call_operand.vmem [shape: f32[1,128], index: 2, kind: input, shape index: {}]   ;;  %s480_s3 = inlined_call_operand.hbm [shape: bf16[128,128], index: 3, kind: input, shape index: {}]   ;;  %s481_s4 = inlined_call_operand.vmem [shape: f32[1,128], index: 4, kind: input, shape index: {}]   ;;  %s482_s5 = inlined_call_operand.vmem [shape: f32[8,128], index: 5, kind: output, shape index: {}]  }
   0x1   :  { %11 = vsyncpa [#allocation5], 0  ;;  %s423_s18 = smov [#allocation2]  }
   0x2   :  { %s19_s19 = sshll.u32 %s423_s18, 4  ;;  %s20_s19 = int_to_ptr.vmem [resolvable:$true] %s19_s19 }
   0x3   :  { %s387_s20 = scalar_lea.vmem %s20_s19, 1024  ;;  %p392_p1 = scmp.lt.s32.totalorder %s20_s19, %s20_s19 }
   0x4   :  { %p388_p0 = scmp.ne.s32.totalorder %s20_s19, %s387_s20  ;;  %p393_p2 = scmp.lt.s32.totalorder %s387_s20, %s387_s20 }
   0x6   :  { %p394_p3 = por %p393_p2, %p392_p1 }
   0x8   :  { %p395_p4 = pnand %p394_p3, %p388_p0 }
   0xa   :  { %398 = shalt.err (!%p395_p4)
}
   0xb   :  { %s424_s21 = smov 64   ;;  %s425_s22 = smov 4  }
   0xc   :  { %25 = dma.hbm_to_vmem [thread:$0]  %s478_s1, 1024, %s20_s19, [#allocation3], %s424_s21, %s424_s21, %s425_s22  }
   0xd   :  { %s426_s25 = smov [#allocation4]  }
   0xe   :  { %s33_s26 = sshll.u32 %s426_s25, 4  ;;  %s34_s26 = int_to_ptr.vmem [resolvable:$true] %s33_s26 }
   0xf   :  { %s407_s27 = scalar_lea.vmem %s34_s26, 1024  ;;  %p412_p6 = scmp.lt.s32.totalorder %s34_s26, %s34_s26 }
  0x10   :  { %p408_p5 = scmp.ne.s32.totalorder %s34_s26, %s407_s27  ;;  %p413_p7 = scmp.lt.s32.totalorder %s407_s27, %s407_s27 }
  0x12   :  { %p414_p8 = por %p413_p7, %p412_p6 }
  0x14   :  { %p415_p9 = pnand %p414_p8, %p408_p5 }
  0x16   :  { %418 = shalt.err (!%p415_p9)
}
  0x17   :  { %39 = dma.hbm_to_vmem [thread:$0]  %s480_s3, 1024, %s34_s26, [#allocation5], %s424_s21, %s424_s21, %s425_s22  }
  0x18   :  { %419 = dma.done.wait [#allocation3], 1024  }
  0x19   :  { %420 = vsyncadd [#allocation3], 4294966272 }
  0x1a   :  { %421 = dma.done.wait [#allocation5], 1024  }
  0x1b   :  { %422 = vsyncadd [#allocation5], 4294966272  ;;  %v427_v0 = vmov 0.0   ;;  %vm428_vm0 = vmmov 0   ;;  %v363_v1 = vld [vmem:[#allocation2 + $0x38] sm:$0xff]   ;;  %v364_v2 = vld [vmem:[#allocation2 + $0x30] sm:$0xff]  }
  0x1c   :  { %317 = vmatprep.subr.bf16.mxu0 %v427_v0  ;;  %333 = vmatprep.mubr.msk.bf16.mxu0 %vm428_vm0, %v427_v0  ;;  %v365_v3 = vld [vmem:[#allocation2 + $0x28] sm:$0xff]   ;;  %v371_v4 = vld [vmem:[#allocation4 + $0x38] sm:$0xff]   ;;  %v366_v5 = vld [vmem:[#allocation2 + $0x20] sm:$0xff]  }
  0x1d   :  { %337 = vmatprep.subr.bf16.mxu1 %v427_v0  ;;  %353 = vmatprep.mubr.msk.bf16.mxu1 %vm428_vm0, %v427_v0  ;;  %v372_v6 = vld [vmem:[#allocation4 + $0x30] sm:$0xff]   ;;  %v367_v7 = vld [vmem:[#allocation2 + $0x18] sm:$0xff]   ;;  %v373_v8 = vld [vmem:[#allocation4 + $0x28] sm:$0xff]  }
  0x1e   :  { %318 = vmatpush3.bf16.msra.mxu0 %v363_v1  ;;  %338 = vmatpush3.bf16.msra.mxu1 %v371_v4  ;;  %v368_v9 = vld [vmem:[#allocation2 + $0x10] sm:$0xff]   ;;  %v374_v10 = vld [vmem:[#allocation4 + $0x20] sm:$0xff]   ;;  %v369_v11 = vld [vmem:[#allocation2 + $0x8] sm:$0xff]  }
  0x1f   :  { %319 = vmatprep.subr.bf16.mxu0 %v427_v0  ;;  %339 = vmatprep.subr.bf16.mxu1 %v427_v0  ;;  %v375_v12 = vld [vmem:[#allocation4 + $0x18] sm:$0xff]   ;;  %v370_v13 = vld [vmem:[#allocation2] sm:$0xff]   ;;  %v376_v14 = vld [vmem:[#allocation4 + $0x10] sm:$0xff]  }
  0x20   :  { %v49_v15 = vld [vmem:[%s477_s0] sm:$0xf]  ;;  %v377_v16 = vld [vmem:[#allocation4 + $0x8] sm:$0xff]  }
  0x21   :  { %v378_v17 = vld [vmem:[#allocation4] sm:$0xff]  }
  0x22   :  { %320 = vmatpush3.bf16.msra.mxu0 %v364_v2  ;;  %340 = vmatpush3.bf16.msra.mxu1 %v372_v6  ;;  %v281_v18 = vld [vmem:[%s479_s2] ss:$0 sm:$0xff] }
  0x23   :  { %321 = vmatprep.subr.bf16.mxu0 %v427_v0  ;;  %341 = vmatprep.subr.bf16.mxu1 %v427_v0  ;;  %v290_v26 = vld [vmem:[%s481_s4] ss:$0 sm:$0xff] }
  0x26   :  { %322 = vmatpush3.bf16.msra.mxu0 %v365_v3  ;;  %342 = vmatpush3.bf16.msra.mxu1 %v373_v8 }
  0x27   :  { %323 = vmatprep.subr.bf16.mxu0 %v427_v0  ;;  %343 = vmatprep.subr.bf16.mxu1 %v427_v0 }
  0x2a   :  { %324 = vmatpush3.bf16.msra.mxu0 %v366_v5  ;;  %344 = vmatpush3.bf16.msra.mxu1 %v374_v10 }
  0x2b   :  { %325 = vmatprep.subr.bf16.mxu0 %v427_v0  ;;  %345 = vmatprep.subr.bf16.mxu1 %v427_v0 }
  0x2e   :  { %326 = vmatpush3.bf16.msra.mxu0 %v367_v7  ;;  %346 = vmatpush3.bf16.msra.mxu1 %v375_v12 }
  0x2f   :  { %327 = vmatprep.subr.bf16.mxu0 %v427_v0  ;;  %347 = vmatprep.subr.bf16.mxu1 %v427_v0 }
  0x32   :  { %328 = vmatpush3.bf16.msra.mxu0 %v368_v9  ;;  %348 = vmatpush3.bf16.msra.mxu1 %v376_v14 }
  0x33   :  { %329 = vmatprep.subr.bf16.mxu0 %v427_v0  ;;  %349 = vmatprep.subr.bf16.mxu1 %v427_v0 }
  0x36   :  { %330 = vmatpush3.bf16.msra.mxu0 %v369_v11  ;;  %350 = vmatpush3.bf16.msra.mxu1 %v377_v16 }
  0x37   :  { %331 = vmatprep.subr.bf16.mxu0 %v427_v0  ;;  %351 = vmatprep.subr.bf16.mxu1 %v427_v0 }
  0x3a   :  { %332 = vmatpush3.bf16.msra.mxu0 %v370_v13  ;;  %352 = vmatpush3.bf16.msra.mxu1 %v378_v17 }
  0x3d   :  { %334 = vmatmul.mubr.bf16.vlgmr.msra.gmra.mxu0 %v49_v15 }
  0xfd   :  { %v155_v19 = vpop.f32.mrf.mxu0 }
  0xfe   :  { %v156_v20 = vadd.f32 %v281_v18, %v155_v19 }
  0xff   :  { %v335_v21 = vpop.f32.mrf.mxu0 }
 0x100   :  { %v161_v22 = vmax.f32 %v156_v20, 0.0 }
 0x101   :  { %v158_v23 = vpop.f32.mrf.mxu0 }
 0x102   :  { %v162_v24 = vpack.c.bf16 %v161_v22, %v161_v22 }
 0x103   :  { %v336_v25 = vpop.f32.mrf.mxu0 }
 0x104   :  { %354 = vmatmul.mubr.bf16.vlgmr.msra.gmra.mxu1 %v162_v24 }
 0x1c4   :  { %v268_v27 = vpop.f32.mrf.mxu1 }
 0x1c5   :  { %v269_v28 = vadd.f32 %v290_v26, %v268_v27 }
 0x1c6   :  { %v355_v29 = vpop.f32.mrf.mxu1 }
 0x1c7   :  { %274 = vst [vmem:[%s482_s5] sm:$0xff] %v269_v28 }
 0x1c8   :  { %v271_v30 = vpop.f32.mrf.mxu1 }
 0x1ca   :  { %v356_v31 = vpop.f32.mrf.mxu1 }
 0x1cb   :  { %279 = vsyncpa [#allocation3], 1 }
 0x1cc   :  { %280 = vsyncpa [#allocation5], 1 }

</bundles_post_ra>
